<compile_context>
chip_gen: v7x
topology: tpu7x:2x2x1
jax: 0.10.0
libtpu: 0.0.40
codegen_flags: <defaults>
</compile_context>

<pallas_src>
import jax
import jax.numpy as jnp
from jax.experimental import pallas as pl
from jax.experimental.pallas import tpu as pltpu


def residual_net_kernel(x_ref, w1_ref, b1_ref, w2_ref, b2_ref, w3_ref, b3_ref, o_ref):
    # One (TB, D) batch tile; weights/biases are VMEM-resident across the grid.
    x = x_ref[...]
    # block 0: x = relu(x @ W1 + b1) + x
    h = jnp.dot(x, w1_ref[...], preferred_element_type=jnp.float32) + b1_ref[...]
    x = jnp.maximum(h, 0.0) + x
    # block 1: x = relu(x @ W2 + b2) + x
    h = jnp.dot(x, w2_ref[...], preferred_element_type=jnp.float32) + b2_ref[...]
    x = jnp.maximum(h, 0.0) + x
    # head: only the real OUT columns are produced and written back
    y = jnp.dot(x, w3_ref[...], preferred_element_type=jnp.float32) + b3_ref[...]
    o_ref[...] = y.astype(o_ref.dtype)


def residual_net(x, w1, b1, w2, b2, w3, b3, *, block_b=4096):
    """x: (B, D); weights stored (in, out); returns (B, OUT) float32."""
    B, D = x.shape
    OUT = w3.shape[1]
    assert w1.shape == (D, D) and w2.shape == (D, D) and w3.shape == (D, OUT)

    f32 = jnp.float32
    x = x.astype(f32)
    w1 = w1.astype(f32)
    w2 = w2.astype(f32)
    w3 = w3.astype(f32)
    b1 = b1.reshape(1, D).astype(f32)
    b2 = b2.reshape(1, D).astype(f32)
    b3 = b3.reshape(1, OUT).astype(f32)

    # ---- batch tiling --------------------------------------------------------
    B8 = -(-B // 8) * 8                 # sublane-aligned batch
    TB = min(block_b, B8)
    if B8 >= 16:                        # guarantee >=2 tiles so v7x's 2 TCs both run
        TB = min(TB, -(-B8 // 16) * 8)
    TB = max(8, (TB // 8) * 8)          # multiple of 8 sublanes
    B_pad = -(-B // TB) * TB
    n_tiles = B_pad // TB

    # Batch-only zero padding (no lane padding). Padded rows are sliced off.
    if B_pad != B:
        x = jnp.pad(x, ((0, B_pad - B), (0, 0)))

    def resident(shape):
        # constant index_map -> block fetched once, stays in VMEM across grid
        return pl.BlockSpec(shape, lambda i: (0, 0))

    # Advisory cost model (matches the new, smaller HBM footprint).
    flops = 2 * B_pad * D * (2 * D + OUT)
    bytes_accessed = (B_pad * (D + OUT) + 2 * D * D + D * OUT + 2 * D + OUT) * 4

    # Scoped-VMEM budget: double-buffered x/out tiles + resident weights, with
    # headroom; floor at the v6e/v7x default (safe on v5e's 128 MiB physical),
    # cap at v7x's 64 MiB physical per-TC VMEM.
    vmem_need = 2 * (TB * (D + OUT) + 2 * D * D + D * OUT + 2 * D + OUT) * 4
    vmem_limit = int(min(64 * 1024 * 1024, max(2 * vmem_need, 32 * 1024 * 1024)))

    out = pl.pallas_call(
        residual_net_kernel,
        out_shape=jax.ShapeDtypeStruct((B_pad, OUT), f32),
        grid=(n_tiles,),
        in_specs=[
            pl.BlockSpec((TB, D), lambda i: (i, 0)),   # x: streamed per batch tile
            resident((D, D)), resident((1, D)),        # W1, b1 (VMEM-resident)
            resident((D, D)), resident((1, D)),        # W2, b2
            resident((D, OUT)), resident((1, OUT)),    # W3, b3
        ],
        out_specs=pl.BlockSpec((TB, OUT), lambda i: (i, 0)),
        compiler_params=pltpu.CompilerParams(
            dimension_semantics=("parallel",),
            vmem_limit_bytes=vmem_limit),
        cost_estimate=pl.CostEstimate(
            flops=flops, transcendentals=0, bytes_accessed=bytes_accessed),
    )(x, w1, b1, w2, b2, w3, b3)

    return out if B_pad == B else out[:B]


def residual_net_ref(x, w1, b1, w2, b2, w3, b3):
    x = jnp.maximum(x @ w1 + b1, 0.0) + x
    x = jnp.maximum(x @ w2 + b2, 0.0) + x
    return x @ w3 + b3


if __name__ == "__main__":
    B = 10     # not a multiple of 8 -> exercises batch padding + multi-tile grid
    D = 32     # input_dim == layer_sizes[0] == layer_sizes[1] (residual requires this)
    OUT = 1    # layer_sizes[2]

    key = jax.random.PRNGKey(0)
    k = jax.random.split(key, 7)
    # Deterministic synthetic parameters (weights stored as (in, out)).
    w1 = jax.random.normal(k[0], (D, D), jnp.float32) * 0.1
    b1 = jax.random.normal(k[1], (1, D), jnp.float32) * 0.1
    w2 = jax.random.normal(k[2], (D, D), jnp.float32) * 0.1
    b2 = jax.random.normal(k[3], (1, D), jnp.float32) * 0.1
    w3 = jax.random.normal(k[4], (D, OUT), jnp.float32) * 0.1
    b3 = jax.random.normal(k[5], (1, OUT), jnp.float32) * 0.1
    x = jax.random.normal(k[6], (B, D), jnp.float32)

    out = residual_net(x, w1, b1, w2, b2, w3, b3)
    out = jax.block_until_ready(out)

    ref = residual_net_ref(x, w1, b1, w2, b2, w3, b3)
    assert out.shape == (B, OUT)
    assert jnp.allclose(out, ref, atol=1e-5, rtol=1e-5)

    print("KERNEL_OK")
</pallas_src>

<mosaic_0001>
module attributes {stable_mosaic.version = 11 : i64} {
  func.func @residual_net_kernel(%arg0: i32, %arg1: memref<8x32xf32, #tpu.memory_space<vmem>>, %arg2: memref<32x32xf32, #tpu.memory_space<vmem>>, %arg3: memref<1x32xf32, #tpu.memory_space<vmem>>, %arg4: memref<32x32xf32, #tpu.memory_space<vmem>>, %arg5: memref<1x32xf32, #tpu.memory_space<vmem>>, %arg6: memref<32x1xf32, #tpu.memory_space<vmem>>, %arg7: memref<1x1xf32, #tpu.memory_space<vmem>>, %arg8: memref<8x1xf32, #tpu.memory_space<vmem>>) attributes {dimension_semantics = [#tpu.dimension_semantics<parallel>], iteration_bounds = array<i64: 2>, scalar_prefetch = 0 : i64, scratch_operands = 0 : i64, tpu.core_type = #tpu.core_type<tc>, window_params = [{transform_indices = @transform_0, window_bounds = array<i64: 8, 32>}, {pipeline_mode = #tpu.pipeline_mode<synchronous>, transform_indices = @transform_1, window_bounds = array<i64: 32, 32>}, {pipeline_mode = #tpu.pipeline_mode<synchronous>, transform_indices = @transform_2, window_bounds = array<i64: 1, 32>}, {pipeline_mode = #tpu.pipeline_mode<synchronous>, transform_indices = @transform_3, window_bounds = array<i64: 32, 32>}, {pipeline_mode = #tpu.pipeline_mode<synchronous>, transform_indices = @transform_4, window_bounds = array<i64: 1, 32>}, {pipeline_mode = #tpu.pipeline_mode<synchronous>, transform_indices = @transform_5, window_bounds = array<i64: 32, 1>}, {pipeline_mode = #tpu.pipeline_mode<synchronous>, transform_indices = @transform_6, window_bounds = array<i64: 1, 1>}, {transform_indices = @transform_7, window_bounds = array<i64: 8, 1>}]} {
    %c0 = arith.constant 0 : index
    %c0_0 = arith.constant 0 : index
    %0 = vector.load %arg1[%c0, %c0_0] : memref<8x32xf32, #tpu.memory_space<vmem>>, vector<8x32xf32>
    %c0_1 = arith.constant 0 : index
    %c0_2 = arith.constant 0 : index
    %1 = vector.load %arg2[%c0_1, %c0_2] : memref<32x32xf32, #tpu.memory_space<vmem>>, vector<32x32xf32>
    %cst = arith.constant dense<0.000000e+00> : vector<8x32xf32>
    %2 = tpu.matmul %0, %1, %cst {dimension_numbers = #tpu.dot_dimension_numbers<[1], [0], [0], [1], [0, 0, 1, 1], [], []>} : vector<8x32xf32>, vector<32x32xf32>, vector<8x32xf32> -> vector<8x32xf32>
    %c0_3 = arith.constant 0 : index
    %c0_4 = arith.constant 0 : index
    %3 = vector.load %arg3[%c0_3, %c0_4] : memref<1x32xf32, #tpu.memory_space<vmem>>, vector<1x32xf32>
    %4 = vector.broadcast %3 : vector<1x32xf32> to vector<8x32xf32>
    %5 = arith.addf %2, %4 : vector<8x32xf32>
    %cst_5 = arith.constant 0.000000e+00 : f32
    %6 = vector.broadcast %cst_5 : f32 to vector<8x32xf32>
    %7 = arith.maximumf %5, %6 : vector<8x32xf32>
    %8 = arith.addf %7, %0 : vector<8x32xf32>
    %c0_6 = arith.constant 0 : index
    %c0_7 = arith.constant 0 : index
    %9 = vector.load %arg4[%c0_6, %c0_7] : memref<32x32xf32, #tpu.memory_space<vmem>>, vector<32x32xf32>
    %cst_8 = arith.constant dense<0.000000e+00> : vector<8x32xf32>
    %10 = tpu.matmul %8, %9, %cst_8 {dimension_numbers = #tpu.dot_dimension_numbers<[1], [0], [0], [1], [0, 0, 1, 1], [], []>} : vector<8x32xf32>, vector<32x32xf32>, vector<8x32xf32> -> vector<8x32xf32>
    %c0_9 = arith.constant 0 : index
    %c0_10 = arith.constant 0 : index
    %11 = vector.load %arg5[%c0_9, %c0_10] : memref<1x32xf32, #tpu.memory_space<vmem>>, vector<1x32xf32>
    %12 = vector.broadcast %11 : vector<1x32xf32> to vector<8x32xf32>
    %13 = arith.addf %10, %12 : vector<8x32xf32>
    %cst_11 = arith.constant 0.000000e+00 : f32
    %14 = vector.broadcast %cst_11 : f32 to vector<8x32xf32>
    %15 = arith.maximumf %13, %14 : vector<8x32xf32>
    %16 = arith.addf %15, %8 : vector<8x32xf32>
    %c0_12 = arith.constant 0 : index
    %c0_13 = arith.constant 0 : index
    %17 = vector.load %arg6[%c0_12, %c0_13] : memref<32x1xf32, #tpu.memory_space<vmem>>, vector<32x1xf32>
    %cst_14 = arith.constant dense<0.000000e+00> : vector<8x1xf32>
    %18 = tpu.matmul %16, %17, %cst_14 {dimension_numbers = #tpu.dot_dimension_numbers<[1], [0], [0], [1], [0, 0, 1, 1], [], []>} : vector<8x32xf32>, vector<32x1xf32>, vector<8x1xf32> -> vector<8x1xf32>
    %c0_15 = arith.constant 0 : index
    %c0_16 = arith.constant 0 : index
    %19 = vector.load %arg7[%c0_15, %c0_16] : memref<1x1xf32, #tpu.memory_space<vmem>>, vector<1x1xf32>
    %20 = vector.broadcast %19 : vector<1x1xf32> to vector<8x1xf32>
    %21 = arith.addf %18, %20 : vector<8x1xf32>
    %c0_17 = arith.constant 0 : index
    %c0_18 = arith.constant 0 : index
    %22 = vector.load %arg8[%c0_17, %c0_18] : memref<8x1xf32, #tpu.memory_space<vmem>>, vector<8x1xf32>
    tpu.vector_store %arg8[%c0_17, %c0_18], %21 {strides = array<i32>} : memref<8x1xf32, #tpu.memory_space<vmem>>, vector<8x1xf32>,
    return
  }
  func.func @transform_0(%arg0: i32) -> (i32, i32) {
    %c0_i32 = arith.constant 0 : i32
    %c0_i32_0 = arith.constant 0 : i32
    return %arg0, %c0_i32 : i32, i32
  }
  func.func @transform_1(%arg0: i32) -> (i32, i32) {
    %c0_i32 = arith.constant 0 : i32
    %c0_i32_0 = arith.constant 0 : i32
    %c0_i32_1 = arith.constant 0 : i32
    return %c0_i32, %c0_i32_0 : i32, i32
  }
  func.func @transform_2(%arg0: i32) -> (i32, i32) {
    %c0_i32 = arith.constant 0 : i32
    %c0_i32_0 = arith.constant 0 : i32
    %c0_i32_1 = arith.constant 0 : i32
    return %c0_i32, %c0_i32_0 : i32, i32
  }
  func.func @transform_3(%arg0: i32) -> (i32, i32) {
    %c0_i32 = arith.constant 0 : i32
    %c0_i32_0 = arith.constant 0 : i32
    %c0_i32_1 = arith.constant 0 : i32
    return %c0_i32, %c0_i32_0 : i32, i32
  }
  func.func @transform_4(%arg0: i32) -> (i32, i32) {
    %c0_i32 = arith.constant 0 : i32
    %c0_i32_0 = arith.constant 0 : i32
    %c0_i32_1 = arith.constant 0 : i32
    return %c0_i32, %c0_i32_0 : i32, i32
  }
  func.func @transform_5(%arg0: i32) -> (i32, i32) {
    %c0_i32 = arith.constant 0 : i32
    %c0_i32_0 = arith.constant 0 : i32
    %c0_i32_1 = arith.constant 0 : i32
    return %c0_i32, %c0_i32_0 : i32, i32
  }
  func.func @transform_6(%arg0: i32) -> (i32, i32) {
    %c0_i32 = arith.constant 0 : i32
    %c0_i32_0 = arith.constant 0 : i32
    %c0_i32_1 = arith.constant 0 : i32
    return %c0_i32, %c0_i32_0 : i32, i32
  }
  func.func @transform_7(%arg0: i32) -> (i32, i32) {
    %c0_i32 = arith.constant 0 : i32
    %c0_i32_0 = arith.constant 0 : i32
    return %arg0, %c0_i32 : i32, i32
  }
}

</mosaic_0001>

<bundles_post_ra>
// kernel: tpu_custom_call.1
= control target key start
LH: loop header
LB: loop body
LE: loop exit
PB: predicated region body
PF: predicated region fallthrough
CT: control target
= control target key end

     0   :  { %s1108_s0 = inlined_call_operand.hbm [shape: f32[16,32], index: 0, kind: input, shape index: {}]   ;;  %s1109_s1 = inlined_call_operand.vmem [shape: f32[32,32], index: 1, kind: input, shape index: {}]   ;;  %s1110_s2 = inlined_call_operand.vmem [shape: f32[1,32], index: 2, kind: input, shape index: {}]   ;;  %s1111_s3 = inlined_call_operand.hbm [shape: f32[32,32], index: 3, kind: input, shape index: {}]   ;;  %s1112_s4 = inlined_call_operand.vmem [shape: f32[1,32], index: 4, kind: input, shape index: {}]   ;;  %s1113_s5 = inlined_call_operand.vmem [shape: f32[32,1], index: 5, kind: input, shape index: {}]   ;;  %s1114_s6 = inlined_call_operand.<no memory space> [shape: f32[1,1], index: 6, kind: input, shape index: {}]   ;;  %s1115_s7 = inlined_call_operand.vmem [shape: f32[16,1], index: 7, kind: output, shape index: {}]  }
   0x1   :  { %v12_v0 = vstv %s1114_s6 }
   0x2   :  { %13 = vst [vmem:[#allocation2] sm:$0x1] %v12_v0 }
   0x3   :  { %14 = vsyncpa [#allocation4], 0 }
   0x4   :  { %16 = vsyncpa [#allocation4 + $0x1], 0 }
   0x5   :  { %17 = vsyncpa [#allocation6], 0  ;;  %s933_s26 = smov 0   ;;  %s935_s27 = smov 0  }
   0x6   :  { %s937_s28 = smov 0   ;;  %s939_s29 = smov 0  }
   0x7 LB: > { %s952_s6 = sadd.s32 4294967295, %s881_s29   ;;  %p43_p0 = scmp.ne.s32.totalorder %s873_s27, %s869_s26  ;;  %s881_s29 = sphi %s939_s29, %s1130_s29   ;;  %s877_s28 = sphi %s937_s28, %s1129_s28   ;;  %s873_s27 = sphi %s935_s27, %s1128_s27   ;;  %s869_s26 = sphi %s933_s26, %s1127_s26  }
   0x8   : > { %p1116_p1 = scmp.eq.s32.totalorder %s952_s6, 0  ;;  %p647_p2 = scmp.ge.s32.totalorder %s881_s29, 1 }
   0x9   : > { %p206_p3 = scmp.lt.s32.totalorder %s881_s29, 3  ;;  %s883_s9 = smov [#allocation5]  }
   0xa   : > { %p960_p4 = por %p1116_p1, %p43_p0  ;;  %s224_s10 = sshll.u32 %s883_s9, 4  ;;  %s225_s10 = int_to_ptr.vmem [resolvable:$true] %s224_s10 }
   0xb   : > { %p964_p5 = pnand %p647_p2, %p206_p3  ;;  %s977_s12 = sadd.s32 1, %s881_s29  }
   0xc   : > { %s1119_s30 = scalar_select %p960_p4, 1, 0 }
   0xd   : > { %s1120_s8 = scalar_select %p964_p5, 1, 0 }
   0xe   : > { %p736_p6 = pneg %p964_p5  ;;  %s30_s13 = sadd.s32 1, %s877_s28 }
   0xf   : > { %s27_s14 = ssub.s32 %s881_s29, %s977_s12  ;;  %s785_s17 = scalar_lea.hbm %s1111_s3, 512 }
  0x10   : > { %p972_p7 = pnand %p736_p6, %p1116_p1  ;;  %p786_p8 = scmp.ne.s32.totalorder %s1111_s3, %s785_s17 }
  0x11   : > { %p792_p12 = scmp.lt.u32.totalorder %s785_s17, %s1111_s3 }
  0x12   : > { %p787_p9 = pneg %p972_p7 }
  0x14   : > { %p788_p10 = pnand %p787_p9, %p786_p8 }
  0x16   : > { %p789_p11 = pneg %p788_p10 }
  0x18   : > { %p794_p13 = pnand %p792_p12, %p789_p11 }
  0x1a   : > { %797 = shalt.err (!%p794_p13)
}
  0x1b   : > { %s798_s22 = scalar_lea.vmem %s225_s10, 512  ;;  %p806_p6 = scmp.lt.s32.totalorder %s225_s10, %s225_s10 }
  0x1c   : > { %p799_p0 = scmp.ne.s32.totalorder %s225_s10, %s798_s22  ;;  %p807_p1 = scmp.lt.s32.totalorder %s798_s22, %s798_s22 }
  0x1e   : > { %p801_p2 = pnand %p799_p0, %p787_p9  ;;  %p808_p4 = por %p807_p1, %p806_p6 }
  0x20   : > { %p802_p3 = pneg %p801_p2 }
  0x22   : > { %p809_p5 = pnand %p808_p4, %p802_p3 }
  0x24   : > { %812 = shalt.err (!%p809_p5)
}
  0x25   : > { %s884_s23 = smov 128   ;;  %s885_s24 = smov 8  }
  0x26   : > { %739 = dma.hbm_to_vmem [thread:$0]  (!%p972_p7), %s1111_s3, 512, %s225_s10, [#allocation6], %s884_s23, %s884_s23, %s885_s24  }
  0x27   : > { %p28_p8 = scmp.eq.s32.totalorder %s27_s14, 0  ;;  %p37_p9 = scmp.ne.s32.totalorder %s877_s28, %s873_s27 }
  0x28   : > { %p38_p1 = scmp.eq.s32.totalorder %s881_s29, 0  ;;  %p745_p4 = scmp.lt.s32.totalorder %s881_s29, 2 }
  0x29   : > { %s1003_s9 = scalar_select %p28_p8, %s877_s28, %s30_s13  }
  0x2a   : > { %p39_p5 = por %p38_p1, %p37_p9  ;;  %s247_s15 = sand.u32 1, %s877_s28  }
  0x2b   : > { %s650_s16 = sshll.u32 %s247_s15, 3  ;;  %s651_s17 = sshll.u32 %s881_s29, 7 }
  0x2c   : > { %s1010_s20 = scalar_lea.hbm %s1108_s0, %s651_s17  ;;  %s251_s10 = scalar_lea.vmem [#allocation3], %s650_s16 }
  0x2d   : > { %s258_s11 = sshll.u32 %s251_s10, 4  ;;  %p1014_p7 = pnand %p745_p4, %p39_p5  ;;  %s1012_s11 = int_to_ptr.vmem [resolvable:$true] %s258_s11 }
  0x2e   : > { %s248_s29 = scalar_lea.sflag [#allocation4], %s247_s15  ;;  %s813_s14 = scalar_lea.hbm %s1010_s20, 128 }
  0x2f   : > { %p814_p10 = scmp.ne.s32.totalorder %s1010_s20, %s813_s14  ;;  %p815_p11 = pneg %p1014_p7 }
  0x30   : > { %s818_s23 = scalar_lea.hbm %s1108_s0, 256  ;;  %p819_p0 = scmp.lt.u32.totalorder %s1010_s20, %s1108_s0 }
  0x31   : > { %p816_p12 = pnand %p815_p11, %p814_p10  ;;  %p820_p2 = scmp.lt.u32.totalorder %s818_s23, %s813_s14 }
  0x32   : > { %p822_p6 = scmp.lt.u32.totalorder %s813_s14, %s1010_s20 }
  0x33   : > { %p817_p13 = pneg %p816_p12  ;;  %p821_p3 = por %p820_p2, %p819_p0 }
  0x35   : > { %p823_p8 = por %p822_p6, %p821_p3 }
  0x37   : > { %p824_p9 = pnand %p823_p8, %p817_p13 }
  0x39   : > { %827 = shalt.err (!%p824_p9)
}
  0x3a   : > { %s828_s26 = scalar_lea.vmem %s1012_s11, 128  ;;  %s886_s15 = smov [#allocation3]  }
  0x3b   : > { %p829_p1 = scmp.ne.s32.totalorder %s1012_s11, %s828_s26  ;;  %s833_s16 = sshll.u32 %s886_s15, 4  ;;  %s834_s16 = int_to_ptr.vmem [resolvable:$false] %s833_s16 }
  0x3c   : > { %s835_s17 = scalar_lea.vmem %s834_s16, 256  ;;  %p836_p10 = scmp.lt.s32.totalorder %s1012_s11, %s834_s16 }
  0x3d   : > { %p831_p4 = pnand %p829_p1, %p815_p11  ;;  %p837_p12 = scmp.lt.s32.totalorder %s835_s17, %s828_s26 }
  0x3f   : > { %p832_p5 = pneg %p831_p4  ;;  %p838_p0 = por %p837_p12, %p836_p10 }
  0x41   : > { %p839_p2 = pnand %p838_p0, %p832_p5 }
  0x43   : > { %842 = shalt.err (!%p839_p2)
}
  0x44   : > { %743 = dma.hbm_to_vmem [thread:$0]  (!%p1014_p7), %s1010_s20, 128, %s1012_s11, %s248_s29  }
  0x45   : > { %p1123_p13 = scmp.ne.s32.totalorder %s1120_s8, 0 }
  0x46   : > { %s269_s18 = sand.u32 (!%p1123_p13), 1, %s873_s27   ;;  %p1124_p11 = scmp.ne.s32.totalorder (!%p1123_p13), %s1119_s30, 0 }
  0x47   : > { %267 = sbr.rel (%p1123_p13) target bundleno = 743 (0x2e7), region = 48  ;;  %s653_s19 = sshll.u32 (!%p1123_p13), %s269_s18, 3 }
  0x48   : > { %s270_s10 = scalar_lea.sflag (!%p1123_p13), [#allocation4], %s269_s18  ;;  %s273_s14 = scalar_lea.vmem (!%p1123_p13), [#allocation3], %s653_s19 }
  0x4e   : > { %860 = dma.done.wait (%p1124_p11), %s270_s10, 128  }
  0x4f   : > { %862 = vsyncadd (%p1124_p11), %s270_s10, 4294967168  ;;  %p1125_p3 = scmp.eq.s32.totalorder %s952_s6, 0 }
  0x51   : > { %864 = dma.done.wait (%p1125_p3), [#allocation6], 512   ;;  %p1126_p6 = pmov %p1125_p3 }
  0x52   : > { %v887_v1 = vmov 0.0|0.0   ;;  %vm888_vm0 = vmmov 0   ;;  %v889_v2 = vmov 0.0   ;;  %v312_v3 = vld [vmem:[%s1109_s1] sm:$0xff]  ;;  %v313_v4 = vld [vmem:[%s1109_s1 + $0x8] sm:$0xff]  ;;  %v314_v5 = vld [vmem:[%s1109_s1 + $0x10] sm:$0xff] }
  0x53   : > { %866 = vsyncadd (%p1126_p6), [#allocation6], 4294966784  ;;  %712 = vmatprep.subr.bf16.mxu0 %v887_v1  ;;  %687 = vmatprep.mubr.msk.f32.mxu0 %vm888_vm0, %v889_v2  ;;  %v713_v6 = vpack.c.bf16 %v313_v4, %v312_v3  ;;  %v315_v7 = vld [vmem:[%s1109_s1 + $0x18] sm:$0xff]  ;;  %v311_v9 = vld [vmem:[%s273_s14] sm:$0xff]  ;;  %vm323_vm1 = vcmask 261120   ;;  %p307_p7 = scmp.lt.s32.totalorder %s952_s6, 1 }
  0x54   : > { %718 = vmatprep.subr.bf16.mxu1 %v887_v1  ;;  %698 = vmatprep.mubr.msk.f32.mxu1 %vm888_vm0, %v889_v2  ;;  %v716_v8 = vpack.c.bf16 %v315_v7, %v314_v5  ;;  %v399_v10 = vld [vmem:[#allocation5] sm:$0xff]  ;;  %v400_v11 = vld [vmem:[#allocation5 + $0x8] sm:$0xff]  ;;  %v401_v13 = vld [vmem:[#allocation5 + $0x10] sm:$0xff]  ;;  %vm569_vm2 = vcmask 7168  }
  0x55   : > { %714 = vmatpush3.bf16.msra.mxu0 %v713_v6  ;;  %v719_v12 = vpack.c.bf16 %v400_v11, %v399_v10  ;;  %v402_v14 = vld [vmem:[#allocation5 + $0x18] sm:$0xff]  ;;  %v656_v16 = vld [vmem:[%s1110_s2] ss:$0 sm:$0xff]  ;;  %v488_v26 = vld [vmem:[%s1113_s5 + $0x18] sm:$0xff]  ;;  %s1132_s6 = smov (!%p307_p7, %s952_s6), 1 }
  0x56   : > { %715 = vmatprep.subr.bf16.mxu0 %v887_v1  ;;  %v722_v15 = vpack.c.bf16 %v402_v14, %v401_v13  ;;  %v485_v22 = vld [vmem:[%s1113_s5] sm:$0xff]  ;;  %v486_v23 = vld [vmem:[%s1113_s5 + $0x8] sm:$0xff]  ;;  %v487_v25 = vld [vmem:[%s1113_s5 + $0x10] sm:$0xff]  ;;  %s655_s20 = sshll.u32 %s1132_s6, 3 }
  0x57   : > { %720 = vmatpush3.bf16.msra.mxu1 %v719_v12  ;;  %v725_v24 = vpack.c.bf16 %v486_v23, %v485_v22  ;;  %v728_v27 = vpack.c.bf16 %v488_v26, %v487_v25  ;;  %v658_v28 = vld [vmem:[%s1112_s4] ss:$0 sm:$0xff]  ;;  %s310_s13 = scalar_lea.vmem %s1115_s7, %s655_s20 }
  0x58   : > { %721 = vmatprep.subr.bf16.mxu1 %v887_v1  ;;  %v660_v34 = vld [vmem:[#allocation2] ss:$0 sm:$0xff] }
  0x59   : > { %717 = vmatpush3.bf16.msra.mxu0 %v716_v8 }
  0x5a   : > { %724 = vmatprep.subr.bf16.mxu0 %v887_v1 }
  0x5b   : > { %723 = vmatpush3.bf16.msra.mxu1 %v722_v15 }
  0x5c   : > { %688 = vmatmul.mubr.msk.f32.vlgmr.msra.gmra.mrb[0].mxu0 %vm323_vm1, %v311_v9 }
  0x5d   : > { %709 = vmatprep.mubr.msk.f32.mxu0 %vm888_vm0, %v889_v2  ;;  %726 = vmatpush3.bf16.msra.mxu0 %v725_v24 }
  0x5e   : > { %727 = vmatprep.subr.bf16.mxu0 %v887_v1 }
  0x61   : > { %729 = vmatpush3.bf16.msra.mxu0 %v728_v27 }
 0x12f   : > { %v393_v17 = vpop.f32.mrb[0].mxu0 }
 0x130   : > { %v394_v18 = vadd.f32 %v656_v16, %v393_v17  ;;  %v689_v19 = vpop.f32.mrb[1].mxu0 }
 0x132   : > { %v397_v20 = vmax.f32 %v394_v18, 0.0 }
 0x134   : > { %v398_v21 = vadd.f32 %v397_v20, %v311_v9 }
 0x136   : > { %699 = vmatmul.mubr.msk.f32.vlgmr.msra.gmra.mrb[0].mxu1 %vm323_vm1, %v398_v21 }
 0x209   : > { %v479_v29 = vpop.f32.mrb[0].mxu1 }
 0x20a   : > { %v480_v30 = vadd.f32 %v658_v28, %v479_v29  ;;  %v700_v31 = vpop.f32.mrb[1].mxu1 }
 0x20c   : > { %v483_v32 = vmax.f32 %v480_v30, 0.0 }
 0x20e   : > { %v484_v33 = vadd.f32 %v483_v32, %v398_v21 }
 0x210   : > { %710 = vmatmul.mubr.msk.f32.vlgmr.msra.gmra.mrb[2].mxu0 %vm323_vm1, %v484_v33 }
 0x2e3   : > { %v565_v35 = vpop.f32.mrb[2].mxu0 }
 0x2e4   : > { %v566_v36 = vadd.f32 %v660_v34, %v565_v35  ;;  %v711_v37 = vpop.f32.mrb[3].mxu0 }
 0x2e6   : > { %570 = vst.msk [vmem:[%s310_s13] sm:$0xff] %vm569_vm2, %v566_v36 }
 0x2e7 PF: > { %p20_p8 = scmp.ge.s32.totalorder %s977_s12, 4   ;;  %s1127_s26 = smov %s873_s27 }
 0x2e8   : > { %s1128_s27 = smov %s877_s28  ;;  %s1129_s28 = smov %s1003_s9 }
 0x2e9   : > { %s1130_s29 = smov %s977_s12  ;;  %22 = sbr.rel (!%p20_p8) target bundleno = 7 (0x7), region = 92 }
 0x2f0   :  { %590 = vsyncpa [#allocation4], 1 }
 0x2f1   :  { %592 = vsyncpa [#allocation4 + $0x1], 1 }
 0x2f2   :  { %593 = vsyncpa [#allocation6], 1 }

</bundles_post_ra>
